<compile_context>
chip_gen: v5e
topology: v5e:2x2
jax: 0.10.0
libtpu: 0.0.40
codegen_flags: <defaults>
</compile_context>

<pallas_src>
import jax
import jax.numpy as jnp
from jax.experimental import pallas as pl
from jax.experimental.pallas import tpu as pltpu


def _add_pos_kernel(x_ref, emb_ref, o_ref):
    # x_ref / o_ref: (br, bw) row-chunk of the flattened (B, S*D) view
    # emb_ref:       (1, bw) matching slice of the flattened positional-emb row
    o_ref[...] = x_ref[...] + emb_ref[...]


def _largest_divisor_multiple(dim, unit, cap):
    """Largest multiple of `unit` that divides `dim` and is <= cap; 0 if none."""
    k = min(cap, dim) // unit
    while k > 0:
        cand = k * unit
        if dim % cand == 0:
            return cand
        k -= 1
    return 0


def _chip_budget():
    """Return (vmem_limit_bytes, per_buffer_target_bytes, want_two_programs)."""
    try:
        vmem_cap = pltpu.get_tpu_info().vmem_capacity_bytes
    except Exception:
        vmem_cap = 64 * 1024 * 1024  # unknown -> assume the tightest (v7x-sized) part
    if vmem_cap >= 96 * 1024 * 1024:
        # v5e / v6e: 128 MiB physical VMEM. Push the scoped limit and tile size up
        # to amortize the ~0.35 us per-grid-step overhead on a purely DMA-bound op.
        return 64 * 1024 * 1024, 10 * 1024 * 1024, False
    # v7x: 64 MiB physical VMEM per TensorCore, 2 TCs per chip.
    # Stay conservative on scoped VMEM, but make sure the grid splits across cores.
    return 32 * 1024 * 1024, 4 * 1024 * 1024, True


def _select_tiles(B, W, itemsize, target_bytes):
    """Pick (br, bw) tile for the flattened (B, W) view, ~target_bytes/buffer."""
    target_elems = max(128, target_bytes // itemsize)
    sub_unit = 8 * max(1, 4 // itemsize)  # 8 f32 / 16 bf16 / 32 int8-fp8

    # ---- width (lane) tile ----
    if W % 128 == 0:
        # Small-batch aware: only min(B, sub_unit) rows are available, so let bw
        # fill the byte budget instead of assuming 8 rows.
        lane_cap = max(128, target_elems // max(1, min(B, sub_unit)))
        bw = _largest_divisor_multiple(W, 128, lane_cap) or W
    else:
        # Full width is always layout-legal; the caller pads W when this would
        # exceed the per-buffer budget, so here it is small enough.
        bw = W

    # ---- row (sublane) tile ----
    rows_cap = max(1, target_elems // bw)
    if B <= rows_cap:
        br = B
    else:
        br = _largest_divisor_multiple(B, sub_unit, rows_cap)
        if br == 0:
            br = _largest_divisor_multiple(B, 8, rows_cap)
        if br == 0:
            br = B  # last resort (B has no multiple-of-8 divisor <= cap)
    return br, bw


def pos_embedding_forward(x, pos_emb_table):
    """x: (B, S, D); pos_emb_table: (n_posidx, D).  Returns x + pos_emb[0:S]."""
    B, S, D = x.shape
    n_posidx, D2 = pos_emb_table.shape
    assert D == D2 and S <= n_posidx

    # Slice + cast the table ONCE in the wrapper (no per-step VPU cast; halves
    # emb DMA bytes when x is bf16 and the table is f32).
    emb = pos_emb_table[:S].astype(x.dtype)            # (S, D)

    # Lane-dense flattened views.
    W = S * D
    x2 = x.reshape(B, W)                               # (B, S*D)
    emb2 = emb.reshape(1, W)                           # (1, S*D)

    vmem_limit, target_bytes, want_split = _chip_budget()
    itemsize = x.dtype.itemsize

    # Robustness: if W is not lane-aligned AND a single full-width row would blow
    # the per-buffer budget, pad W up to a multiple of a 128-aligned chunk so it
    # can be tiled (padding is sliced back off the output).
    W_orig = W
    padded = False
    if W % 128 != 0 and W * itemsize > target_bytes:
        bw_pad = max(
            128,
            ((target_bytes // itemsize) // max(1, min(B, 8))) // 128 * 128,
        )
        Wp = pl.cdiv(W, bw_pad) * bw_pad
        x2 = jnp.pad(x2, ((0, 0), (0, Wp - W)))
        emb2 = jnp.pad(emb2, ((0, 0), (0, Wp - W)))
        W = Wp
        padded = True

    br, bw = _select_tiles(B, W, itemsize, target_bytes)

    # v7x: guarantee >= 2 grid programs so both TensorCores get work.
    if want_split and (W // bw) * (B // br) < 2:
        if br % 16 == 0:          # halving keeps a multiple of 8 (and divides B)
            br //= 2
        elif bw % 256 == 0:       # halving keeps a multiple of 128 (and divides W)
            bw //= 2
        # else: problem too small to be worth splitting.

    grid = (W // bw, B // br)     # width-chunks OUTER, batch-chunks INNER
                                  # -> emb block index constant across inner steps

    out2 = pl.pallas_call(
        _add_pos_kernel,
        out_shape=jax.ShapeDtypeStruct((B, W), x.dtype),
        grid_spec=pltpu.PrefetchScalarGridSpec(
            num_scalar_prefetch=0,
            grid=grid,
            in_specs=[
                pl.BlockSpec((br, bw), lambda j, i: (i, j)),   # x rows
                pl.BlockSpec((1, bw), lambda j, i: (0, j)),    # emb (batch-invariant)
            ],
            out_specs=pl.BlockSpec((br, bw), lambda j, i: (i, j)),
        ),
        input_output_aliases={0: 0},   # in-place over x when the caller donates it
        compiler_params=pltpu.CompilerParams(
            dimension_semantics=("parallel", "parallel"),
            vmem_limit_bytes=vmem_limit,
        ),
    )(x2, emb2)

    if padded:
        out2 = out2[:, :W_orig]
    return out2.reshape(B, S, D)


if __name__ == "__main__":
    key = jax.random.PRNGKey(0)
    k_x, k_emb, k_x2, k_emb2 = jax.random.split(key, 4)

    # Toy shapes consistent with the module: batch=2, seq=8, hidden=32.
    B, S, D = 2, 8, 32
    n_posidx = 200

    x = jax.random.normal(k_x, (B, S, D), dtype=jnp.float32)
    pos_emb_table = jax.random.normal(k_emb, (n_posidx, D), dtype=jnp.float32)

    out = jax.block_until_ready(pos_embedding_forward(x, pos_emb_table))
    ref = x + pos_emb_table[:S][None, :, :]
    assert out.shape == (B, S, D)
    assert jnp.allclose(out, ref, atol=1e-6), "mismatch vs reference (f32)"

    # Second check: bf16 activations with a wider hidden dim (exercises the
    # wrapper-side cast path, dtype-aware sublane unit and bigger lane tiles).
    Bb, Sb, Db = 8, 16, 128
    xb = jax.random.normal(k_x2, (Bb, Sb, Db), dtype=jnp.bfloat16)
    tblb = jax.random.normal(k_emb2, (n_posidx, Db), dtype=jnp.float32)
    outb = jax.block_until_ready(pos_embedding_forward(xb, tblb))
    refb = xb + tblb[:Sb].astype(jnp.bfloat16)[None, :, :]
    assert outb.shape == (Bb, Sb, Db)
    assert jnp.allclose(outb.astype(jnp.float32), refb.astype(jnp.float32)), \
        "mismatch vs reference (bf16)"

    print("KERNEL_OK")
</pallas_src>

<mosaic_0001>
module attributes {stable_mosaic.version = 11 : i64} {
  func.func @_add_pos_kernel(%arg0: i32, %arg1: i32, %arg2: memref<2x128xf32, #tpu.memory_space<vmem>>, %arg3: memref<1x128xf32, #tpu.memory_space<vmem>>, %arg4: memref<2x128xf32, #tpu.memory_space<vmem>>) attributes {dimension_semantics = [#tpu.dimension_semantics<parallel>, #tpu.dimension_semantics<parallel>], iteration_bounds = array<i64: 2, 1>, scalar_prefetch = 0 : i64, scratch_operands = 0 : i64, tpu.core_type = #tpu.core_type<tc>, window_params = [{transform_indices = @transform_0, window_bounds = array<i64: 2, 128>}, {transform_indices = @transform_1, window_bounds = array<i64: 1, 128>}, {transform_indices = @transform_2, window_bounds = array<i64: 2, 128>}]} {
    %c0 = arith.constant 0 : index
    %c0_0 = arith.constant 0 : index
    %0 = vector.load %arg2[%c0, %c0_0] : memref<2x128xf32, #tpu.memory_space<vmem>>, vector<2x128xf32>
    %c0_1 = arith.constant 0 : index
    %c0_2 = arith.constant 0 : index
    %1 = vector.load %arg3[%c0_1, %c0_2] : memref<1x128xf32, #tpu.memory_space<vmem>>, vector<1x128xf32>
    %2 = vector.broadcast %1 : vector<1x128xf32> to vector<2x128xf32>
    %3 = arith.addf %0, %2 : vector<2x128xf32>
    %c0_3 = arith.constant 0 : index
    %c0_4 = arith.constant 0 : index
    %4 = vector.load %arg4[%c0_3, %c0_4] : memref<2x128xf32, #tpu.memory_space<vmem>>, vector<2x128xf32>
    tpu.vector_store %arg4[%c0_3, %c0_4], %3 {strides = array<i32>} : memref<2x128xf32, #tpu.memory_space<vmem>>, vector<2x128xf32>,
    return
  }
  func.func @transform_0(%arg0: i32, %arg1: i32) -> (i32, i32) {
    %c0_i32 = arith.constant 0 : i32
    return %arg1, %arg0 : i32, i32
  }
  func.func @transform_1(%arg0: i32, %arg1: i32) -> (i32, i32) {
    %c0_i32 = arith.constant 0 : i32
    %c0_i32_0 = arith.constant 0 : i32
    return %c0_i32, %arg0 : i32, i32
  }
  func.func @transform_2(%arg0: i32, %arg1: i32) -> (i32, i32) {
    %c0_i32 = arith.constant 0 : i32
    return %arg1, %arg0 : i32, i32
  }
}

</mosaic_0001>

<bundles_post_ra>
// kernel: tpu_custom_call.1
= control target key start
LH: loop header
LB: loop body
LE: loop exit
PB: predicated region body
PF: predicated region fallthrough
CT: control target
= control target key end

     0   :  { %7 = vsyncpa [#allocation3], 0  ;;  %s639_s0 = inlined_call_operand.hbm [shape: f32[2,256], index: 0, kind: input, shape index: {}, may-alias: {0,2}]   ;;  %s640_s1 = inlined_call_operand.vmem [shape: f32[1,256], index: 1, kind: input, shape index: {}]   ;;  %s641_s2 = inlined_call_operand.hbm [shape: f32[2,256], index: 2, kind: output, shape index: {}, may-alias: {0,2}]  }
   0x1   :  { %9 = vsyncpa [#allocation3 + $0x1], 0 }
   0x2   :  { %10 = vsyncpa [#allocation4], 0 }
   0x3   :  { %12 = vsyncpa [#allocation4 + $0x1], 0  ;;  %s514_s9 = smov 0   ;;  %s516_s10 = smov 0  }
   0x4   :  { %s518_s11 = smov 0   ;;  %s520_s12 = smov 0  }
   0x5   :  { %s522_s13 = smov 0   ;;  %s524_s14 = smov 0  }
   0x6 LB: > { %s309_s15 = sadd.s32 4294967295, %s497_s14   ;;  %s310_s16 = sadd.s32 4294967294, %s497_s14   ;;  %s497_s14 = sphi %s524_s14, %s18_s14   ;;  %s493_s13 = sphi %s522_s13, %s650_s13   ;;  %s489_s12 = sphi %s520_s12, %s649_s12   ;;  %s485_s11 = sphi %s518_s11, %s648_s11   ;;  %s481_s10 = sphi %s516_s10, %s647_s10   ;;  %s477_s9 = sphi %s514_s9, %s646_s9  }
   0x7   : > { %s30_s17 = sadd.s32 1, %s493_s13  ;;  %s39_s18 = sadd.s32 1, %s485_s11 }
   0x8   : > { %p32_p0 = scmp.ge.s32.totalorder %s30_s17, 2  ;;  %p46_p1 = scmp.ne.s32.totalorder %s485_s11, %s481_s10 }
   0x9   : > { %p47_p2 = scmp.eq.s32.totalorder %s497_s14, 0  ;;  %p52_p3 = scmp.ne.s32.totalorder %s481_s10, %s477_s9 }
   0xa   : > { %s652_s17 = smov (%p32_p0, %s30_s17), 0  ;;  %p53_p5 = scmp.eq.s32.totalorder %s309_s15, 0 }
   0xb   : > { %p555_p4 = por %p47_p2, %p46_p1  ;;  %s35_s20 = ssub.s32 %s493_s13, %s652_s17 }
   0xc   : > { %p104_p6 = scmp.eq.s32.totalorder %s309_s15, 1  ;;  %p37_p7 = scmp.eq.s32.totalorder %s35_s20, 0 }
   0xd   : > { %p561_p8 = por %p53_p5, %p52_p3  ;;  %p110_p10 = scmp.eq.s32.totalorder %s310_s16, 1 }
   0xe   : > { %p565_p9 = por %p104_p6, %p46_p1  ;;  %p312_p12 = scmp.ge.s32.totalorder %s497_s14, 2 }
   0xf   : > { %s570_s23 = scalar_select %p37_p7, %s485_s11, %s39_s18  }
  0x10   : > { %p572_p11 = por %p110_p10, %p52_p3  ;;  %p334_p13 = scmp.lt.s32.totalorder %s497_s14, 2 }
  0x11   : > { %s130_s25 = sand.u32 1, %s485_s11   ;;  %s314_s27 = sshll.u32 %s493_s13, 1 }
  0x12   : > { %s313_s26 = sshll.u32 %s130_s25, 1  ;;  %s140_s30 = scalar_lea.hbm %s639_s0, %s314_s27 }
  0x13   : > { %s134_s3 = scalar_lea.vmem [#allocation2], %s313_s26  ;;  %s142_s5 = sshll.u32 %s140_s30, 4  ;;  %s143_s5 = int_to_ptr.hbm [resolvable:$true] %s142_s5 }
  0x14   : > { %s144_s4 = sshll.u32 %s134_s3, 4  ;;  %p327_p0 = pnand %p334_p13, %p555_p4  ;;  %s145_s4 = int_to_ptr.vmem [resolvable:$true] %s144_s4 }
  0x15   : > { %p315_p1 = scmp.ge.s32.totalorder %s497_s14, 1  ;;  %p155_p2 = scmp.lt.s32.totalorder %s497_s14, 3 }
  0x16   : > { %s131_s6 = scalar_lea.sflag [#allocation3], %s130_s25 }
  0x17   : > { %329 = dma.hbm_to_vmem [thread:$0]  (!%p327_p0), %s143_s5, 32, %s145_s4, %s131_s6  }
  0x18   : > { %p156_p3 = pnand %p315_p1, %p155_p2 }
  0x19   : > { %s588_s7 = sand.u32 (!%p156_p3), 1, %s481_s10  }
  0x1a   : > { %159 = sbr.rel (%p156_p3) target bundleno = 49 (0x31), region = 28  ;;  %s316_s8 = sshll.u32 (!%p156_p3), %s588_s7, 1 }
  0x1b   : > { %s162_s15 = scalar_lea.sflag (!%p156_p3), [#allocation3], %s588_s7  ;;  %s165_s16 = scalar_lea.vmem (!%p156_p3), [#allocation2], %s316_s8 }
  0x1f   : > { %468 = dma.done.wait (%p561_p8), %s162_s15, 32  }
  0x20   : > { %470 = vsyncadd (%p561_p8), %s162_s15, 4294967264  ;;  %p190_p4 = scmp.lt.s32.totalorder %s489_s12, 1  ;;  %s319_s19 = sshll.u32 %s489_s12, 1  ;;  %v193_v0 = vld [vmem:[%s165_s16] sm:$0x3] }
  0x21   : > { %s213_s29 = scalar_lea.hbm %s641_s2, %s319_s19  ;;  %s189_s30 = scalar_lea.vmem [#allocation5], %s316_s8 }
  0x22   : > { %s191_s18 = scalar_select %p190_p4, %s489_s12, 1 }
  0x23   : > { %s215_s3 = sshll.u32 %s189_s30, 4  ;;  %s217_s21 = sshll.u32 %s213_s29, 4  ;;  %s216_s3 = int_to_ptr.vmem [resolvable:$true] %s215_s3  ;;  %s218_s21 = int_to_ptr.hbm [resolvable:$true] %s217_s21 }
  0x24   : > { %s192_s26 = scalar_lea.vmem %s640_s1, %s191_s18  ;;  %s201_s4 = scalar_lea.sflag [#allocation4], %s588_s7 }
  0x25   : > { %v384_v1 = vld [vmem:[%s192_s26] ss:$0 sm:$0xff]  ;;  %s429_s12 = sshra.s32 %s218_s21, 4  ;;  %s435_s8 = scalar_lea.hbm %s641_s2, 4  ;;  %s430_s12 = int_to_ptr.hbm [resolvable:$true] %s429_s12 }
  0x26   : > { %v198_v2 = vadd.f32 %v384_v1, %v193_v0  ;;  %s431_s5 = scalar_lea.hbm %s430_s12, 2  ;;  %p436_p8 = scmp.lt.s32.totalorder %s430_s12, %s641_s2 }
  0x27   : > { %p432_p5 = scmp.ne.s32.totalorder %s430_s12, %s431_s5  ;;  %p437_p10 = scmp.lt.s32.totalorder %s435_s8, %s431_s5 }
  0x28   : > { %199 = vst [vmem:[%s189_s30] sm:$0x3] %v198_v2 }
  0x29   : > { %p433_p6 = pnand %p432_p5, %p565_p9  ;;  %p438_p13 = por %p437_p10, %p436_p8 }
  0x2b   : > { %p434_p7 = pneg %p433_p6 }
  0x2d   : > { %p439_p0 = pnand %p438_p13, %p434_p7 }
  0x2f   : > { %442 = shalt.err (!%p439_p0)
}
  0x30   : > { %324 = dma.vmem_to_hbm [thread:$0]  (%p565_p9), %s216_s3, 32, %s218_s21, %s201_s4  }
  0x31 PF: > { %s229_s7 = sand.u32 1, %s477_s9   ;;  %p331_p1 = pnand %p312_p12, %p572_p11 }
  0x32   : > { %s230_s16 = scalar_lea.sflag [#allocation4], %s229_s7 }
  0x33   : > { %p332_p2 = pneg %p331_p1 }
  0x35   : > { %472 = dma.done.wait (%p332_p2), %s230_s16, 32  }
  0x36   : > { %474 = vsyncadd (%p332_p2), %s230_s16, 4294967264  ;;  %s18_s14 = sadd.s32 1, %s497_s14   ;;  %s646_s9 = smov %s481_s10 }
  0x37   : > { %p15_p3 = scmp.ge.s32.totalorder %s18_s14, 4   ;;  %s647_s10 = smov %s485_s11 }
  0x38   : > { %s648_s11 = smov %s570_s23  ;;  %s649_s12 = smov %s493_s13 }
  0x39   : > { %s650_s13 = smov %s652_s17  ;;  %17 = sbr.rel (!%p15_p3) target bundleno = 6 (0x6), region = 76 }
  0x3e   :  { %236 = vsyncpa [#allocation3], 1 }
  0x3f   :  { %238 = vsyncpa [#allocation3 + $0x1], 1 }
  0x40   :  { %239 = vsyncpa [#allocation4], 1 }
  0x41   :  { %241 = vsyncpa [#allocation4 + $0x1], 1 }

</bundles_post_ra>
